<compile_context>
chip_gen: v7x
topology: tpu7x:2x2x1
jax: 0.10.0
libtpu: 0.0.40
codegen_flags: <defaults>
</compile_context>

<pallas_src>
import jax
import jax.numpy as jnp
from jax.experimental import pallas as pl
from jax.experimental.pallas import tpu as pltpu


def _pad_to(v, m):
    return ((v + m - 1) // m) * m


def _vmem_limit_bytes():
    """~75% of physical VMEM (48 MiB on v7x, 96 MiB on v5e/v6e), safe fallback."""
    try:
        info = pltpu.get_tpu_info()
        cap = int(getattr(info, "vmem_capacity_bytes", 64 * 1024 * 1024))
    except Exception:
        cap = 64 * 1024 * 1024
    return min(int(cap * 0.75), 100 * 1024 * 1024)


def _plan_tiles(n, tm=None, tk=None):
    """Pick (n_pad, tm, tk) with tm | tk | n_pad, all multiples of 128."""
    n128 = _pad_to(max(n, 1), 128)
    if tm is None:
        tm = 128
        for cand in (512, 256):           # keep >=2 row blocks for 2-TC split
            if n128 >= 2 * cand:
                tm = cand
                break
    n_pad = _pad_to(n128, tm)
    if tk is None:
        tk = tm
        cand = (min(2048, n_pad) // tm) * tm
        while cand > tm:
            if n_pad % cand == 0:
                tk = cand
                break
            cand -= tm
    else:
        n_pad = _pad_to(n_pad, tk)
    assert tk % tm == 0, "tk must be a multiple of tm"
    assert n_pad % tm == 0 and n_pad % tk == 0
    return n_pad, tm, tk


def _a_blockspec(tm, tk, k_steps):
    """A-stream BlockSpec; triple-buffered when the k reduction is long enough."""
    idx = lambda i, k: (i, k)
    if k_steps >= 3:
        try:
            return pl.BlockSpec((tm, tk), idx, pipeline_mode=pl.Buffered(3))
        except TypeError:   # older BlockSpec without pipeline_mode
            pass
    return pl.BlockSpec((tm, tk), idx)


# ----------------------------- Pallas kernels -----------------------------

def _encoder_small_kernel(x_ref, a_ref, w0_ref, b0_ref, w1_ref, b1_ref,
                          w2_ref, b2_ref, z_ref):
    """Whole-graph fused encoder (single grid point, everything VMEM-resident)."""
    h = jnp.dot(x_ref[...], w0_ref[...], preferred_element_type=jnp.float32)
    h = (h + b0_ref[...]).astype(jnp.bfloat16)
    hw1 = jnp.dot(h, w1_ref[...],
                  preferred_element_type=jnp.float32).astype(jnp.bfloat16)
    h1 = jnp.dot(a_ref[...], hw1, preferred_element_type=jnp.float32) + b1_ref[...]
    h1 = jnp.maximum(h1, 0.0).astype(jnp.bfloat16)
    hw2 = jnp.dot(h1, w2_ref[...],
                  preferred_element_type=jnp.float32).astype(jnp.bfloat16)
    z_ref[...] = jnp.dot(a_ref[...], hw2,
                         preferred_element_type=jnp.float32) + b2_ref[...]


def _conv1_fused_kernel(xk_ref, w0_ref, b0_ref, w1_ref, a_ref, b1_ref, w2_ref,
                        hw2_ref, acc_ref):
    """Fused node_attr_layer + conv1 + relu + conv2 weight matmul (k-reduction).

      hw1_k  = ((X[k] @ W0 + b0).bf16 @ W1).bf16     (recomputed per tile; MXU slack)
      acc   += A[i,k] @ hw1_k                        (f32 VMEM accumulator)
      last k: HW2[i] = relu(acc + b1).bf16 @ W2      (bias only in finalize branch)
    """
    k = pl.program_id(1)

    @pl.when(k == 0)
    def _():
        acc_ref[...] = jnp.zeros_like(acc_ref)

    h = jnp.dot(xk_ref[...], w0_ref[...], preferred_element_type=jnp.float32)
    h = (h + b0_ref[...]).astype(jnp.bfloat16)
    hw1_k = jnp.dot(h, w1_ref[...],
                    preferred_element_type=jnp.float32).astype(jnp.bfloat16)
    acc_ref[...] += jnp.dot(a_ref[...], hw1_k,
                            preferred_element_type=jnp.float32)

    @pl.when(k == pl.num_programs(1) - 1)
    def _():
        h1 = jnp.maximum(acc_ref[...] + b1_ref[...], 0.0).astype(jnp.bfloat16)
        hw2_ref[...] = jnp.dot(h1, w2_ref[...],
                               preferred_element_type=jnp.float32).astype(jnp.bfloat16)


def _conv2_kernel(a_ref, hw2_ref, b2_ref, z_ref, acc_ref):
    """conv2 aggregation: Z[i] = sum_k A[i,k] @ HW2[k] + b2."""
    k = pl.program_id(1)

    @pl.when(k == 0)
    def _():
        acc_ref[...] = jnp.zeros_like(acc_ref)

    acc_ref[...] += jnp.dot(a_ref[...], hw2_ref[...],
                            preferred_element_type=jnp.float32)

    @pl.when(k == pl.num_programs(1) - 1)
    def _():
        # NOTE: padded rows of z equal b2 (acc==0 + b2); decode() only reads
        # real node rows, so this never leaks into results.
        z_ref[...] = acc_ref[...] + b2_ref[...]


def _decoder_kernel(zs_ref, zd_ref, out_ref):
    """Dot-product decoder, lane-dense output: out[0,e] = sum_d zs[d,e]*zd[d,e]."""
    out_ref[...] = jnp.sum(zs_ref[...] * zd_ref[...], axis=0, keepdims=True)


# ------------------------------- wrappers ----------------------------------

def node_encode(x, a_pad, params, *, tm=None, tk=None, force_tiled=False):
    """GCN encoder. `a_pad` is the pre-padded bf16 normalized adjacency."""
    n, f_in = x.shape
    n_pad = a_pad.shape[0]
    hidden = params["w1"].shape[0]
    out_dim = params["w2"].shape[1]
    f32, bf16 = jnp.float32, jnp.bfloat16

    f_pad = _pad_to(f_in, 128)
    h_pad = _pad_to(hidden, 128)
    o_pad = _pad_to(out_dim, 128)

    n_plan, tm, tk = _plan_tiles(n_pad, tm, tk)
    assert n_plan == n_pad, "a_pad was built with a different tile plan"

    # Per-forward padding is only O(N*F) / O(F^2) — A_hat (O(N^2)) was padded
    # and cast once in build_gcn_adj. bf16 operands, f32 MXU accumulation.
    xb = jnp.zeros((n_pad, f_pad), bf16).at[:n, :f_in].set(x.astype(bf16))
    w0 = jnp.zeros((f_pad, h_pad), bf16).at[:f_in, :hidden].set(params["w0"].astype(bf16))
    w1 = jnp.zeros((h_pad, h_pad), bf16).at[:hidden, :hidden].set(params["w1"].astype(bf16))
    w2 = jnp.zeros((h_pad, o_pad), bf16).at[:hidden, :out_dim].set(params["w2"].astype(bf16))
    b0 = jnp.zeros((1, h_pad), f32).at[:, :hidden].set(params["b0"])
    b1 = jnp.zeros((1, h_pad), f32).at[:, :hidden].set(params["b1"])
    b2 = jnp.zeros((1, o_pad), f32).at[:, :out_dim].set(params["b2"])

    vmem_limit = _vmem_limit_bytes()

    # --- small-graph fast path: one fused kernel, everything in VMEM ---------
    fast_bytes = (2 * n_pad * (n_pad + f_pad)
                  + 2 * (f_pad * h_pad + h_pad * h_pad + h_pad * o_pad)
                  + n_pad * (10 * h_pad + 6 * o_pad))
    if (not force_tiled) and fast_bytes <= 20 * 1024 * 1024:
        return pl.pallas_call(
            _encoder_small_kernel,
            out_shape=jax.ShapeDtypeStruct((n_pad, o_pad), f32),
            compiler_params=pltpu.CompilerParams(vmem_limit_bytes=vmem_limit),
        )(xb, a_pad, w0, b0, w1, b1, w2, b2)

    # --- tiled path -----------------------------------------------------------
    k_steps = n_pad // tk
    a_spec = _a_blockspec(tm, tk, k_steps)

    # stage A: fused node_attr + conv1 aggregation + relu + conv2 weight matmul
    hw2 = pl.pallas_call(
        _conv1_fused_kernel,
        out_shape=jax.ShapeDtypeStruct((n_pad, o_pad), bf16),
        grid_spec=pltpu.PrefetchScalarGridSpec(
            num_scalar_prefetch=0,
            grid=(n_pad // tm, k_steps),
            in_specs=[
                pl.BlockSpec((tk, f_pad), lambda i, k: (k, 0)),   # X[k]
                pl.BlockSpec((f_pad, h_pad), lambda i, k: (0, 0)),
                pl.BlockSpec((1, h_pad), lambda i, k: (0, 0)),
                pl.BlockSpec((h_pad, h_pad), lambda i, k: (0, 0)),
                a_spec,                                           # A[i,k]
                pl.BlockSpec((1, h_pad), lambda i, k: (0, 0)),
                pl.BlockSpec((h_pad, o_pad), lambda i, k: (0, 0)),
            ],
            out_specs=pl.BlockSpec((tm, o_pad), lambda i, k: (i, 0)),
            scratch_shapes=[pltpu.VMEM((tm, h_pad), f32)],
        ),
        compiler_params=pltpu.CompilerParams(
            dimension_semantics=("parallel", "arbitrary"),
            vmem_limit_bytes=vmem_limit),
    )(xb, w0, b0, w1, a_pad, b1, w2)

    # stage B: conv2 aggregation + bias
    # TODO(synk): A_hat is streamed twice (stage A and B); symmetric tiling or
    # a persistent per-tile two-layer scheme could roughly halve that traffic.
    z = pl.pallas_call(
        _conv2_kernel,
        out_shape=jax.ShapeDtypeStruct((n_pad, o_pad), f32),
        grid_spec=pltpu.PrefetchScalarGridSpec(
            num_scalar_prefetch=0,
            grid=(n_pad // tm, k_steps),
            in_specs=[
                a_spec,
                pl.BlockSpec((tk, o_pad), lambda i, k: (k, 0)),
                pl.BlockSpec((1, o_pad), lambda i, k: (0, 0)),
            ],
            out_specs=pl.BlockSpec((tm, o_pad), lambda i, k: (i, 0)),
            scratch_shapes=[pltpu.VMEM((tm, o_pad), f32)],
        ),
        compiler_params=pltpu.CompilerParams(
            dimension_semantics=("parallel", "arbitrary"),
            vmem_limit_bytes=vmem_limit),
    )(a_pad, hw2, b2)

    return z   # (n_pad, o_pad) f32; padded rows equal b2 (never read downstream)


def decode(z_pad, edge_label_index):
    e = edge_label_index.shape[1]
    o_pad = z_pad.shape[1]
    e_pad = _pad_to(e, 128)
    te = 128
    for cand in (1024, 512, 256, 128):
        if e_pad % cand == 0:
            te = cand
            break

    src = jnp.pad(edge_label_index[0], (0, e_pad - e))
    dst = jnp.pad(edge_label_index[1], (0, e_pad - e))
    # Gather + transpose glue (XLA): feature dim on sublanes, edges on lanes so
    # the decoder output is a lane-dense (1, e_pad) slab (unmasked stores).
    # TODO(synk): move this gather into the kernel via scalar-prefetched indices
    # for very large edge batches.
    zs_t = z_pad[src].T           # (o_pad, e_pad)
    zd_t = z_pad[dst].T

    out = pl.pallas_call(
        _decoder_kernel,
        out_shape=jax.ShapeDtypeStruct((1, e_pad), jnp.float32),
        grid_spec=pltpu.PrefetchScalarGridSpec(
            num_scalar_prefetch=0,
            grid=(e_pad // te,),
            in_specs=[
                pl.BlockSpec((o_pad, te), lambda i: (0, i)),
                pl.BlockSpec((o_pad, te), lambda i: (0, i)),
            ],
            out_specs=pl.BlockSpec((1, te), lambda i: (0, i)),
        ),
        compiler_params=pltpu.CompilerParams(
            dimension_semantics=("parallel",),
            vmem_limit_bytes=_vmem_limit_bytes()),
    )(zs_t, zd_t)
    return out[0, :e]


def net_forward(params, a_pad, *, x, edge_label_index,
                tm=None, tk=None, force_tiled=False):
    # Mirrors Net.forward (use_pair_enco=False branch).
    z = node_encode(x, a_pad, params, tm=tm, tk=tk, force_tiled=force_tiled)
    return decode(z, edge_label_index)


# ------------------------------ graph glue ---------------------------------

def build_gcn_adj(edge_index, num_nodes, n_pad):
    """GCN-normalized adjacency D^-1/2 (A + A^T + I) D^-1/2, normalized in f32,
    cast to bf16 and zero-padded to (n_pad, n_pad) ONCE (not per forward)."""
    src, dst = edge_index[0], edge_index[1]
    a = jnp.zeros((num_nodes, num_nodes), jnp.float32)
    a = a.at[src, dst].set(1.0)
    a = jnp.maximum(a, a.T)                                    # undirected
    a = jnp.maximum(a, jnp.eye(num_nodes, dtype=jnp.float32))  # self-loops
    deg = a.sum(axis=1)
    d_inv_sqrt = jnp.where(deg > 0.0, 1.0 / jnp.sqrt(deg), 0.0)
    a = a * d_inv_sqrt[:, None] * d_inv_sqrt[None, :]
    out = jnp.zeros((n_pad, n_pad), jnp.bfloat16)
    return out.at[:num_nodes, :num_nodes].set(a.astype(jnp.bfloat16))


def init_params(key, f_in, hidden, out_dim):
    k0, k1, k2 = jax.random.split(key, 3)
    scale = lambda fan_in: 1.0 / jnp.sqrt(jnp.float32(fan_in))
    return {
        "w0": jax.random.normal(k0, (f_in, hidden), jnp.float32) * scale(f_in),
        "b0": jnp.zeros((1, hidden), jnp.float32),
        "w1": jax.random.normal(k1, (hidden, hidden), jnp.float32) * scale(hidden),
        "b1": jnp.zeros((1, hidden), jnp.float32),
        "w2": jax.random.normal(k2, (hidden, out_dim), jnp.float32) * scale(hidden),
        "b2": jnp.zeros((1, out_dim), jnp.float32),
    }


# --------------------------------- main -------------------------------------

if __name__ == "__main__":
    F_IN, HIDDEN, OUT_DIM = 32, 64, 32

    key = jax.random.PRNGKey(0)
    ks = jax.random.split(key, 8)
    params = init_params(ks[0], F_IN, HIDDEN, OUT_DIM)

    fwd = jax.jit(net_forward, static_argnames=("tm", "tk", "force_tiled"))

    def reference(params, a_pad, x, eli, n):
        # pure-JAX reference with the same bf16 quantization points (f32 acc)
        # as the kernel path; deviation from a pure-f32 PyTorch model is ~bf16
        # level and is accepted by design.
        q = lambda a: a.astype(jnp.bfloat16).astype(jnp.float32)
        aq = a_pad[:n, :n].astype(jnp.float32)
        xq = q(x)
        w0q, w1q, w2q = q(params["w0"]), q(params["w1"]), q(params["w2"])
        h = q(xq @ w0q + params["b0"])
        hw1 = q(h @ w1q)
        h1 = q(jnp.maximum(aq @ hw1 + params["b1"], 0.0))
        hw2 = q(h1 @ w2q)
        z = aq @ hw2 + params["b2"]
        return jnp.sum(z[eli[0]] * z[eli[1]], axis=-1)

    # ---- test 1: shipped small graph (fused single-kernel fast path) ----
    N1, E_TRAIN1, E_LABEL1 = 16, 40, 8
    x1 = jax.random.normal(ks[1], (N1, F_IN), jnp.float32)
    ei1 = jax.random.randint(ks[2], (2, E_TRAIN1), 0, N1, jnp.int32)
    eli1 = jax.random.randint(ks[3], (2, E_LABEL1), 0, N1, jnp.int32)
    n_pad1, tm1, tk1 = _plan_tiles(N1)
    a_pad1 = build_gcn_adj(ei1, N1, n_pad1)

    out1 = fwd(params, a_pad1, x=x1, edge_label_index=eli1, tm=tm1, tk=tk1)
    out1 = jax.block_until_ready(out1)
    assert out1.shape == (E_LABEL1,)
    assert bool(jnp.all(jnp.isfinite(out1)))
    ref1 = reference(params, a_pad1, x1, eli1, N1)
    assert bool(jnp.allclose(out1, ref1, atol=1e-2, rtol=1e-2))

    # ---- test 2: force the tiled path (3x3 grid, f32 accumulator pattern) ----
    N2, E_TRAIN2, E_LABEL2 = 300, 900, 64
    x2 = jax.random.normal(ks[4], (N2, F_IN), jnp.float32)
    ei2 = jax.random.randint(ks[5], (2, E_TRAIN2), 0, N2, jnp.int32)
    eli2 = jax.random.randint(ks[6], (2, E_LABEL2), 0, N2, jnp.int32)
    n_pad2, tm2, tk2 = _plan_tiles(N2, 128, 128)
    a_pad2 = build_gcn_adj(ei2, N2, n_pad2)

    out2 = fwd(params, a_pad2, x=x2, edge_label_index=eli2,
               tm=tm2, tk=tk2, force_tiled=True)
    out2 = jax.block_until_ready(out2)
    assert out2.shape == (E_LABEL2,)
    assert bool(jnp.all(jnp.isfinite(out2)))
    ref2 = reference(params, a_pad2, x2, eli2, N2)
    assert bool(jnp.allclose(out2, ref2, atol=1e-2, rtol=1e-2))

    print("KERNEL_OK")
</pallas_src>

<mosaic_0001>
module attributes {stable_mosaic.version = 11 : i64} {
  func.func @_decoder_kernel(%arg0: i32, %arg1: memref<128x128xf32, #tpu.memory_space<vmem>>, %arg2: memref<128x128xf32, #tpu.memory_space<vmem>>, %arg3: memref<1x128xf32, #tpu.memory_space<vmem>>) attributes {dimension_semantics = [#tpu.dimension_semantics<parallel>], iteration_bounds = array<i64: 1>, scalar_prefetch = 0 : i64, scratch_operands = 0 : i64, tpu.core_type = #tpu.core_type<tc>, window_params = [{transform_indices = @transform_0, window_bounds = array<i64: 128, 128>}, {transform_indices = @transform_1, window_bounds = array<i64: 128, 128>}, {transform_indices = @transform_2, window_bounds = array<i64: 1, 128>}]} {
    %c0 = arith.constant 0 : index
    %c0_0 = arith.constant 0 : index
    %0 = vector.load %arg1[%c0, %c0_0] : memref<128x128xf32, #tpu.memory_space<vmem>>, vector<128x128xf32>
    %c0_1 = arith.constant 0 : index
    %c0_2 = arith.constant 0 : index
    %1 = vector.load %arg2[%c0_1, %c0_2] : memref<128x128xf32, #tpu.memory_space<vmem>>, vector<128x128xf32>
    %2 = arith.mulf %0, %1 : vector<128x128xf32>
    %cst = arith.constant dense<0.000000e+00> : vector<128xf32>
    %3 = vector.multi_reduction <add>, %2, %cst [0] : vector<128x128xf32> to vector<128xf32>
    %4 = vector.shape_cast %3 : vector<128xf32> to vector<1x128xf32>
    %c0_3 = arith.constant 0 : index
    %c0_4 = arith.constant 0 : index
    %5 = vector.load %arg3[%c0_3, %c0_4] : memref<1x128xf32, #tpu.memory_space<vmem>>, vector<1x128xf32>
    tpu.vector_store %arg3[%c0_3, %c0_4], %4 {strides = array<i32>} : memref<1x128xf32, #tpu.memory_space<vmem>>, vector<1x128xf32>,
    return
  }
  func.func @transform_0(%arg0: i32) -> (i32, i32) {
    %c0_i32 = arith.constant 0 : i32
    %c0_i32_0 = arith.constant 0 : i32
    return %c0_i32, %arg0 : i32, i32
  }
  func.func @transform_1(%arg0: i32) -> (i32, i32) {
    %c0_i32 = arith.constant 0 : i32
    %c0_i32_0 = arith.constant 0 : i32
    return %c0_i32, %arg0 : i32, i32
  }
  func.func @transform_2(%arg0: i32) -> (i32, i32) {
    %c0_i32 = arith.constant 0 : i32
    %c0_i32_0 = arith.constant 0 : i32
    return %c0_i32, %arg0 : i32, i32
  }
}

module attributes {stable_mosaic.version = 11 : i64} {
  func.func @_encoder_small_kernel(%arg0: memref<128x128xbf16, #tpu.memory_space<vmem>>, %arg1: memref<128x128xbf16, #tpu.memory_space<vmem>>, %arg2: memref<128x128xbf16, #tpu.memory_space<vmem>>, %arg3: memref<1x128xf32, #tpu.memory_space<vmem>>, %arg4: memref<128x128xbf16, #tpu.memory_space<vmem>>, %arg5: memref<1x128xf32, #tpu.memory_space<vmem>>, %arg6: memref<128x128xbf16, #tpu.memory_space<vmem>>, %arg7: memref<1x128xf32, #tpu.memory_space<vmem>>, %arg8: memref<128x128xf32, #tpu.memory_space<vmem>>) attributes {dimension_semantics = [], scalar_prefetch = 0 : i64, scratch_operands = 0 : i64, tpu.core_type = #tpu.core_type<tc>} {
    %c0 = arith.constant 0 : index
    %c0_0 = arith.constant 0 : index
    %0 = vector.load %arg0[%c0, %c0_0] : memref<128x128xbf16, #tpu.memory_space<vmem>>, vector<128x128xbf16>
    %c0_1 = arith.constant 0 : index
    %c0_2 = arith.constant 0 : index
    %1 = vector.load %arg2[%c0_1, %c0_2] : memref<128x128xbf16, #tpu.memory_space<vmem>>, vector<128x128xbf16>
    %cst = arith.constant dense<0.000000e+00> : vector<128x128xf32>
    %2 = tpu.matmul %0, %1, %cst {dimension_numbers = #tpu.dot_dimension_numbers<[1], [0], [0], [1], [0, 0, 1, 1], [], []>} : vector<128x128xbf16>, vector<128x128xbf16>, vector<128x128xf32> -> vector<128x128xf32>
    %c0_3 = arith.constant 0 : index
    %c0_4 = arith.constant 0 : index
    %3 = vector.load %arg3[%c0_3, %c0_4] : memref<1x128xf32, #tpu.memory_space<vmem>>, vector<1x128xf32>
    %4 = vector.broadcast %3 : vector<1x128xf32> to vector<128x128xf32>
    %5 = arith.addf %2, %4 : vector<128x128xf32>
    %6 = arith.truncf %5 : vector<128x128xf32> to vector<128x128xbf16>
    %c0_5 = arith.constant 0 : index
    %c0_6 = arith.constant 0 : index
    %7 = vector.load %arg4[%c0_5, %c0_6] : memref<128x128xbf16, #tpu.memory_space<vmem>>, vector<128x128xbf16>
    %cst_7 = arith.constant dense<0.000000e+00> : vector<128x128xf32>
    %8 = tpu.matmul %6, %7, %cst_7 {dimension_numbers = #tpu.dot_dimension_numbers<[1], [0], [0], [1], [0, 0, 1, 1], [], []>} : vector<128x128xbf16>, vector<128x128xbf16>, vector<128x128xf32> -> vector<128x128xf32>
    %9 = arith.truncf %8 : vector<128x128xf32> to vector<128x128xbf16>
    %c0_8 = arith.constant 0 : index
    %c0_9 = arith.constant 0 : index
    %10 = vector.load %arg1[%c0_8, %c0_9] : memref<128x128xbf16, #tpu.memory_space<vmem>>, vector<128x128xbf16>
    %cst_10 = arith.constant dense<0.000000e+00> : vector<128x128xf32>
    %11 = tpu.matmul %10, %9, %cst_10 {dimension_numbers = #tpu.dot_dimension_numbers<[1], [0], [0], [1], [0, 0, 1, 1], [], []>} : vector<128x128xbf16>, vector<128x128xbf16>, vector<128x128xf32> -> vector<128x128xf32>
    %c0_11 = arith.constant 0 : index
    %c0_12 = arith.constant 0 : index
    %12 = vector.load %arg5[%c0_11, %c0_12] : memref<1x128xf32, #tpu.memory_space<vmem>>, vector<1x128xf32>
    %13 = vector.broadcast %12 : vector<1x128xf32> to vector<128x128xf32>
    %14 = arith.addf %11, %13 : vector<128x128xf32>
    %cst_13 = arith.constant 0.000000e+00 : f32
    %15 = vector.broadcast %cst_13 : f32 to vector<128x128xf32>
    %16 = arith.maximumf %14, %15 : vector<128x128xf32>
    %17 = arith.truncf %16 : vector<128x128xf32> to vector<128x128xbf16>
    %c0_14 = arith.constant 0 : index
    %c0_15 = arith.constant 0 : index
    %18 = vector.load %arg6[%c0_14, %c0_15] : memref<128x128xbf16, #tpu.memory_space<vmem>>, vector<128x128xbf16>
    %cst_16 = arith.constant dense<0.000000e+00> : vector<128x128xf32>
    %19 = tpu.matmul %17, %18, %cst_16 {dimension_numbers = #tpu.dot_dimension_numbers<[1], [0], [0], [1], [0, 0, 1, 1], [], []>} : vector<128x128xbf16>, vector<128x128xbf16>, vector<128x128xf32> -> vector<128x128xf32>
    %20 = arith.truncf %19 : vector<128x128xf32> to vector<128x128xbf16>
    %c0_17 = arith.constant 0 : index
    %c0_18 = arith.constant 0 : index
    %21 = vector.load %arg1[%c0_17, %c0_18] : memref<128x128xbf16, #tpu.memory_space<vmem>>, vector<128x128xbf16>
    %cst_19 = arith.constant dense<0.000000e+00> : vector<128x128xf32>
    %22 = tpu.matmul %21, %20, %cst_19 {dimension_numbers = #tpu.dot_dimension_numbers<[1], [0], [0], [1], [0, 0, 1, 1], [], []>} : vector<128x128xbf16>, vector<128x128xbf16>, vector<128x128xf32> -> vector<128x128xf32>
    %c0_20 = arith.constant 0 : index
    %c0_21 = arith.constant 0 : index
    %23 = vector.load %arg7[%c0_20, %c0_21] : memref<1x128xf32, #tpu.memory_space<vmem>>, vector<1x128xf32>
    %24 = vector.broadcast %23 : vector<1x128xf32> to vector<128x128xf32>
    %25 = arith.addf %22, %24 : vector<128x128xf32>
    %c0_22 = arith.constant 0 : index
    %c0_23 = arith.constant 0 : index
    %26 = vector.load %arg8[%c0_22, %c0_23] : memref<128x128xf32, #tpu.memory_space<vmem>>, vector<128x128xf32>
    tpu.vector_store %arg8[%c0_22, %c0_23], %25 {strides = array<i32>} : memref<128x128xf32, #tpu.memory_space<vmem>>, vector<128x128xf32>,
    return
  }
}

</mosaic_0001>

<bundles_post_ra>
// kernel: net_forward.3
= control target key start
LH: loop header
LB: loop body
LE: loop exit
PB: predicated region body
PF: predicated region fallthrough
CT: control target
= control target key end

     0   :  { %s199_s0 = inlined_call_operand.vmem [shape: f32[128,128], index: 0, kind: input, shape index: {}]   ;;  %s200_s1 = inlined_call_operand.vmem [shape: f32[128,128], index: 1, kind: input, shape index: {}]   ;;  %s201_s2 = inlined_call_operand.vmem [shape: f32[1,128], index: 2, kind: output, shape index: {}]  }
   0x1   :  { %v11_v0 = vld [vmem:[%s199_s0] sm:$0xff]  ;;  %v12_v1 = vld [vmem:[%s199_s0 + $0x8] sm:$0xff]  ;;  %v13_v2 = vld [vmem:[%s199_s0 + $0x10] sm:$0xff] }
   0x2   :  { %v14_v3 = vld [vmem:[%s199_s0 + $0x18] sm:$0xff]  ;;  %v27_v4 = vld [vmem:[%s200_s1] sm:$0xff]  ;;  %v28_v5 = vld [vmem:[%s200_s1 + $0x8] sm:$0xff] }
   0x3   :  { %v29_v6 = vld [vmem:[%s200_s1 + $0x10] sm:$0xff]  ;;  %v30_v7 = vld [vmem:[%s200_s1 + $0x18] sm:$0xff]  ;;  %v43_v8 = vmul.f32 %v27_v4, %v11_v0  ;;  %v44_v9 = vmul.f32 %v28_v5, %v12_v1  ;;  %v15_v10 = vld [vmem:[%s199_s0 + $0x20] sm:$0xff] }
   0x4   :  { %v31_v11 = vld [vmem:[%s200_s1 + $0x20] sm:$0xff]  ;;  %v45_v12 = vmul.f32 %v29_v6, %v13_v2  ;;  %v46_v13 = vmul.f32 %v30_v7, %v14_v3  ;;  %v16_v15 = vld [vmem:[%s199_s0 + $0x28] sm:$0xff]  ;;  %v17_v19 = vld [vmem:[%s199_s0 + $0x30] sm:$0xff] }
   0x5   :  { %v59_v14 = vadd.f32 %v44_v9, %v43_v8  ;;  %v32_v16 = vld [vmem:[%s200_s1 + $0x28] sm:$0xff]  ;;  %v47_v17 = vmul.f32 %v31_v11, %v15_v10  ;;  %v33_v20 = vld [vmem:[%s200_s1 + $0x30] sm:$0xff]  ;;  %v18_v23 = vld [vmem:[%s199_s0 + $0x38] sm:$0xff] }
   0x6   :  { %v48_v21 = vmul.f32 %v32_v16, %v16_v15  ;;  %v34_v24 = vld [vmem:[%s200_s1 + $0x38] sm:$0xff]  ;;  %v49_v25 = vmul.f32 %v33_v20, %v17_v19  ;;  %v19_v27 = vld [vmem:[%s199_s0 + $0x40] sm:$0xff]  ;;  %v20_v31 = vld [vmem:[%s199_s0 + $0x48] sm:$0xff] }
   0x7   :  { %v60_v18 = vadd.f32 %v59_v14, %v45_v12  ;;  %v35_v28 = vld [vmem:[%s200_s1 + $0x40] sm:$0xff]  ;;  %v50_v29 = vmul.f32 %v34_v24, %v18_v23  ;;  %v36_v32 = vld [vmem:[%s200_s1 + $0x48] sm:$0xff]  ;;  %v21_v35 = vld [vmem:[%s199_s0 + $0x50] sm:$0xff] }
   0x8   :  { %v51_v33 = vmul.f32 %v35_v28, %v19_v27  ;;  %v37_v36 = vld [vmem:[%s200_s1 + $0x50] sm:$0xff]  ;;  %v52_v37 = vmul.f32 %v36_v32, %v20_v31  ;;  %v22_v39 = vld [vmem:[%s199_s0 + $0x58] sm:$0xff]  ;;  %v23_v43 = vld [vmem:[%s199_s0 + $0x60] sm:$0xff] }
   0x9   :  { %v61_v22 = vadd.f32 %v60_v18, %v46_v13  ;;  %v38_v40 = vld [vmem:[%s200_s1 + $0x58] sm:$0xff]  ;;  %v53_v41 = vmul.f32 %v37_v36, %v21_v35  ;;  %v39_v44 = vld [vmem:[%s200_s1 + $0x60] sm:$0xff]  ;;  %v24_v47 = vld [vmem:[%s199_s0 + $0x68] sm:$0xff] }
   0xa   :  { %v54_v45 = vmul.f32 %v38_v40, %v22_v39  ;;  %v40_v48 = vld [vmem:[%s200_s1 + $0x68] sm:$0xff]  ;;  %v55_v49 = vmul.f32 %v39_v44, %v23_v43  ;;  %v25_v51 = vld [vmem:[%s199_s0 + $0x70] sm:$0xff]  ;;  %v26_v55 = vld [vmem:[%s199_s0 + $0x78] sm:$0xff] }
   0xb   :  { %v62_v26 = vadd.f32 %v61_v22, %v47_v17  ;;  %v41_v52 = vld [vmem:[%s200_s1 + $0x70] sm:$0xff]  ;;  %v56_v53 = vmul.f32 %v40_v48, %v24_v47  ;;  %v42_v56 = vld [vmem:[%s200_s1 + $0x78] sm:$0xff] }
   0xc   :  { %v57_v57 = vmul.f32 %v41_v52, %v25_v51  ;;  %v58_v59 = vmul.f32 %v42_v56, %v26_v55 }
   0xd   :  { %v63_v30 = vadd.f32 %v62_v26, %v48_v21 }
   0xf   :  { %v64_v34 = vadd.f32 %v63_v30, %v49_v25 }
  0x11   :  { %v65_v38 = vadd.f32 %v64_v34, %v50_v29 }
  0x13   :  { %v66_v42 = vadd.f32 %v65_v38, %v51_v33 }
  0x15   :  { %v67_v46 = vadd.f32 %v66_v42, %v52_v37 }
  0x17   :  { %v68_v50 = vadd.f32 %v67_v46, %v53_v41 }
  0x19   :  { %v69_v54 = vadd.f32 %v68_v50, %v54_v45 }
  0x1b   :  { %v70_v58 = vadd.f32 %v69_v54, %v55_v49 }
  0x1d   :  { %v71_v60 = vadd.f32 %v70_v58, %v56_v53 }
  0x1f   :  { %v72_v61 = vadd.f32 %v71_v60, %v57_v57 }
  0x21   :  { %v73_v62 = vadd.f32 %v72_v61, %v58_v59 }
  0x23   :  { %v74_v63 = vrot.slane %v73_v62, 4 }
  0x25   :  { %v75_v0 = vadd.f32 %v74_v63, %v73_v62 }
  0x27   :  { %v76_v1 = vrot.slane %v75_v0, 2 }
  0x29   :  { %v77_v2 = vadd.f32 %v76_v1, %v75_v0 }
  0x2b   :  { %v78_v3 = vrot.slane %v77_v2, 1 }
  0x2d   :  { %v79_v4 = vadd.f32 %v78_v3, %v77_v2 }
  0x2f   :  { %80 = vst [vmem:[%s201_s2] sm:$0x1] %v79_v4 }

// kernel: net_forward.2
= control target key start
LH: loop header
LB: loop body
LE: loop exit
PB: predicated region body
PF: predicated region fallthrough
CT: control target
= control target key end

     0   :  { %s1517_s2 = inlined_call_operand.vmem [shape: bf16[128,128], index: 2, kind: input, shape index: {}]   ;;  %s1518_s0 = inlined_call_operand.vmem [shape: bf16[128,128], index: 0, kind: input, shape index: {}]   ;;  %s1519_s4 = inlined_call_operand.vmem [shape: bf16[128,128], index: 4, kind: input, shape index: {}]   ;;  %s1520_s3 = inlined_call_operand.vmem [shape: f32[1,128], index: 3, kind: input, shape index: {}]   ;;  %s1521_s1 = inlined_call_operand.vmem [shape: bf16[128,128], index: 1, kind: input, shape index: {}]   ;;  %s1522_s6 = inlined_call_operand.vmem [shape: bf16[128,128], index: 6, kind: input, shape index: {}]   ;;  %s1523_s5 = inlined_call_operand.vmem [shape: f32[1,128], index: 5, kind: input, shape index: {}]   ;;  %s1524_s7 = inlined_call_operand.vmem [shape: f32[1,128], index: 7, kind: input, shape index: {}]   ;;  %s1525_s8 = inlined_call_operand.vmem [shape: f32[128,128], index: 8, kind: output, shape index: {}]  }
   0x1   :  { %v1223_v0 = vld [vmem:[%s1517_s2] sm:$0xff]   ;;  %v1224_v1 = vld [vmem:[%s1517_s2 + $0x8] sm:$0xff]   ;;  %v1225_v2 = vld [vmem:[%s1517_s2 + $0x10] sm:$0xff]  }
   0x2   :  { %1047 = vmatprep.subr.bf16.mxu0 %v1223_v0  ;;  %v1226_v3 = vld [vmem:[%s1517_s2 + $0x18] sm:$0xff]   ;;  %v1231_v4 = vld [vmem:[%s1518_s0] sm:$0xff]   ;;  %v1228_v6 = vld [vmem:[%s1517_s2 + $0x28] sm:$0xff]  }
   0x3   :  { %1048 = vmatpush3.bf16.msra.mxu0 %v1223_v0  ;;  %1063 = vmatprep.mubr.bf16.mxu0 %v1231_v4  ;;  %v1227_v5 = vld [vmem:[%s1517_s2 + $0x20] sm:$0xff]   ;;  %v1240_v8 = vld [vmem:[%s1519_s4 + $0x8] sm:$0xff]   ;;  %v1229_v9 = vld [vmem:[%s1517_s2 + $0x30] sm:$0xff]  }
   0x4   :  { %1049 = vmatprep.subr.bf16.mxu0 %v1224_v1  ;;  %v1239_v7 = vld [vmem:[%s1519_s4] sm:$0xff]   ;;  %v1241_v10 = vld [vmem:[%s1519_s4 + $0x10] sm:$0xff]   ;;  %v1230_v11 = vld [vmem:[%s1517_s2 + $0x38] sm:$0xff]  }
   0x5   :  { %1079 = vmatprep.subr.bf16.mxu1 %v1239_v7  ;;  %v1242_v12 = vld [vmem:[%s1519_s4 + $0x18] sm:$0xff]   ;;  %v1243_v13 = vld [vmem:[%s1519_s4 + $0x20] sm:$0xff]   ;;  %v1232_v14 = vld [vmem:[%s1518_s0 + $0x8] sm:$0xff]  }
   0x6   :  { %1080 = vmatpush3.bf16.msra.mxu1 %v1239_v7  ;;  %v1233_v15 = vld [vmem:[%s1518_s0 + $0x10] sm:$0xff]   ;;  %v1244_v16 = vld [vmem:[%s1519_s4 + $0x28] sm:$0xff]   ;;  %v1234_v17 = vld [vmem:[%s1518_s0 + $0x18] sm:$0xff]  }
   0x7   :  { %1050 = vmatpush3.bf16.msra.mxu0 %v1224_v1  ;;  %1081 = vmatprep.subr.bf16.mxu1 %v1240_v8  ;;  %v1235_v18 = vld [vmem:[%s1518_s0 + $0x20] sm:$0xff]   ;;  %v1236_v19 = vld [vmem:[%s1518_s0 + $0x28] sm:$0xff]   ;;  %v1237_v20 = vld [vmem:[%s1518_s0 + $0x30] sm:$0xff]  }
   0x8   :  { %1051 = vmatprep.subr.bf16.mxu0 %v1225_v2  ;;  %v1238_v21 = vld [vmem:[%s1518_s0 + $0x38] sm:$0xff]   ;;  %v1245_v22 = vld [vmem:[%s1519_s4 + $0x30] sm:$0xff]   ;;  %v924_v25 = vld [vmem:[%s1520_s3] ss:$0 sm:$0xff] }
   0x9   :  { %v1246_v23 = vld [vmem:[%s1519_s4 + $0x38] sm:$0xff]   ;;  %v1386_v1 = vld [vmem:[%s1521_s1] sm:$0xff]   ;;  %v1257_v4 = vld [vmem:[%s1522_s6 + $0x10] sm:$0xff]  }
   0xa   :  { %1082 = vmatpush3.bf16.msra.mxu1 %v1240_v8  ;;  %v1260_v7 = vld [vmem:[%s1522_s6 + $0x28] sm:$0xff]  }
   0xb   :  { %1052 = vmatpush3.bf16.msra.mxu0 %v1225_v2  ;;  %1083 = vmatprep.subr.bf16.mxu1 %v1241_v10  ;;  %v1255_v2 = vld [vmem:[%s1522_s6] sm:$0xff]  }
   0xc   :  { %1053 = vmatprep.subr.bf16.mxu0 %v1226_v3 }
   0xe   :  { %1084 = vmatpush3.bf16.msra.mxu1 %v1241_v10 }
   0xf   :  { %1054 = vmatpush3.bf16.msra.mxu0 %v1226_v3  ;;  %1085 = vmatprep.subr.bf16.mxu1 %v1242_v12  ;;  %v1256_v3 = vld [vmem:[%s1522_s6 + $0x8] sm:$0xff]  }
  0x10   :  { %1055 = vmatprep.subr.bf16.mxu0 %v1227_v5 }
  0x12   :  { %1086 = vmatpush3.bf16.msra.mxu1 %v1242_v12 }
  0x13   :  { %1056 = vmatpush3.bf16.msra.mxu0 %v1227_v5  ;;  %1087 = vmatprep.subr.bf16.mxu1 %v1243_v13  ;;  %v1258_v5 = vld [vmem:[%s1522_s6 + $0x18] sm:$0xff]  }
  0x14   :  { %1057 = vmatprep.subr.bf16.mxu0 %v1228_v6 }
  0x16   :  { %1088 = vmatpush3.bf16.msra.mxu1 %v1243_v13 }
  0x17   :  { %1058 = vmatpush3.bf16.msra.mxu0 %v1228_v6  ;;  %1089 = vmatprep.subr.bf16.mxu1 %v1244_v16  ;;  %v1259_v6 = vld [vmem:[%s1522_s6 + $0x20] sm:$0xff]  }
  0x18   :  { %1059 = vmatprep.subr.bf16.mxu0 %v1229_v9 }
  0x1a   :  { %1090 = vmatpush3.bf16.msra.mxu1 %v1244_v16 }
  0x1b   :  { %1060 = vmatpush3.bf16.msra.mxu0 %v1229_v9  ;;  %1091 = vmatprep.subr.bf16.mxu1 %v1245_v22 }
  0x1c   :  { %1061 = vmatprep.subr.bf16.mxu0 %v1230_v11 }
  0x1e   :  { %1092 = vmatpush3.bf16.msra.mxu1 %v1245_v22 }
  0x1f   :  { %1062 = vmatpush3.bf16.msra.mxu0 %v1230_v11  ;;  %1093 = vmatprep.subr.bf16.mxu1 %v1246_v23 }
  0x22   :  { %1064 = vmatmul.mubr.bf16.vlgmr.msra.gmra.mrb[0].mxu0 %v1232_v14  ;;  %1094 = vmatpush3.bf16.msra.mxu1 %v1246_v23 }
  0x23   :  { %1067 = vmatprep.mubr.bf16.mxu0 %v1233_v15  ;;  %1143 = vmatprep.subr.bf16.mxu1 %v1255_v2 }
  0x2a   :  { %1068 = vmatmul.mubr.bf16.gmra.mrb[4].mxu0 %v1234_v17 }
  0x2b   :  { %1071 = vmatprep.mubr.bf16.mxu0 %v1235_v18 }
  0x32   :  { %1072 = vmatmul.mubr.bf16.gmra.mrb[8].mxu0 %v1236_v19 }
  0x33   :  { %1075 = vmatprep.mubr.bf16.mxu0 %v1237_v20 }
  0x3a   :  { %1076 = vmatmul.mubr.bf16.gmra.mrb[12].mxu0 %v1238_v21 }
  0x3b   :  { %1127 = vmatprep.mubr.bf16.mxu0 %v1386_v1 }
  0xf5   :  { %v1065_v24 = vpop.f32.mrb[0].mxu0 }
  0xf6   :  { %v199_v26 = vpop.f32.mrb[1].mxu0  ;;  %v208_v28 = vadd.f32 %v1065_v24, %v924_v25 }
  0xf7   :  { %v1066_v27 = vpop.f32.mrb[2].mxu0  ;;  %v200_v31 = vadd.f32 %v924_v25, %v199_v26 }
  0xf8   :  { %v211_v29 = vadd.f32 %v1066_v27, %v924_v25  ;;  %v202_v30 = vpop.f32.mrb[3].mxu0 }
  0xf9   :  { %v203_v32 = vadd.f32 %v924_v25, %v202_v30 }
  0xfa   :  { %v263_v33 = vpack.c.bf16 %v211_v29, %v208_v28 }
  0xfb   :  { %v262_v34 = vpack.c.bf16 %v203_v32, %v200_v31  ;;  %v1410_v32 = vld [vmem:[%s1521_s1 + $0x8] sm:$0xff]  }
  0xfd   :  { %v1069_v35 = vpop.f32.mrb[4].mxu0  ;;  %1095 = vmatprep.mubr.bf16.mxu1 %v262_v34  ;;  %v1422_v34 = vld [vmem:[%s1521_s1 + $0x18] sm:$0xff]  }
  0xfe   :  { %v215_v36 = vpop.f32.mrb[5].mxu0  ;;  %1096 = vmatmul.mubr.bf16.vlgmr.msra.gmra.mrb[0].mxu1 %v263_v33  ;;  %v224_v38 = vadd.f32 %v1069_v35, %v924_v25  ;;  %v1415_v33 = vld [vmem:[%s1521_s1 + $0x10] sm:$0xff]   ;;  %v1427_v35 = vld [vmem:[%s1521_s1 + $0x20] sm:$0xff]  }
  0xff   :  { %v1070_v37 = vpop.f32.mrb[6].mxu0  ;;  %v216_v41 = vadd.f32 %v924_v25, %v215_v36  ;;  %1144 = vmatpush3.bf16.msra.mxu1 %v1255_v2  ;;  %v1434_v36 = vld [vmem:[%s1521_s1 + $0x28] sm:$0xff]  }
 0x100   :  { %v227_v39 = vadd.f32 %v1070_v37, %v924_v25  ;;  %v218_v40 = vpop.f32.mrb[7].mxu0  ;;  %1145 = vmatprep.subr.bf16.mxu1 %v1256_v3  ;;  %v1439_v37 = vld [vmem:[%s1521_s1 + $0x30] sm:$0xff]  }
 0x101   :  { %v219_v42 = vadd.f32 %v924_v25, %v218_v40  ;;  %v1262_v40 = vld [vmem:[%s1522_s6 + $0x38] sm:$0xff]  }
 0x102   :  { %v265_v43 = vpack.c.bf16 %v227_v39, %v224_v38  ;;  %v1446_v38 = vld [vmem:[%s1521_s1 + $0x38] sm:$0xff]   ;;  %v1261_v39 = vld [vmem:[%s1522_s6 + $0x30] sm:$0xff]  }
 0x103   :  { %v264_v44 = vpack.c.bf16 %v219_v42, %v216_v41  ;;  %1146 = vmatpush3.bf16.msra.mxu1 %v1256_v3  ;;  %v949_v41 = vld [vmem:[%s1523_s5] ss:$0 sm:$0xff] }
 0x104   :  { %1147 = vmatprep.subr.bf16.mxu1 %v1257_v4 }
 0x105   :  { %v1073_v45 = vpop.f32.mrb[8].mxu0  ;;  %1099 = vmatprep.mubr.bf16.mxu1 %v264_v44 }
 0x106   :  { %v231_v46 = vpop.f32.mrb[9].mxu0  ;;  %1100 = vmatmul.mubr.bf16.gmra.mrb[4].mxu1 %v265_v43  ;;  %v240_v48 = vadd.f32 %v1073_v45, %v924_v25 }
 0x107   :  { %v1074_v47 = vpop.f32.mrb[10].mxu0  ;;  %v232_v51 = vadd.f32 %v924_v25, %v231_v46  ;;  %1148 = vmatpush3.bf16.msra.mxu1 %v1257_v4 }
 0x108   :  { %v243_v49 = vadd.f32 %v1074_v47, %v924_v25  ;;  %v234_v50 = vpop.f32.mrb[11].mxu0  ;;  %1149 = vmatprep.subr.bf16.mxu1 %v1258_v5 }
 0x109   :  { %v235_v52 = vadd.f32 %v924_v25, %v234_v50 }
 0x10a   :  { %v267_v53 = vpack.c.bf16 %v243_v49, %v240_v48 }
 0x10b   :  { %v266_v54 = vpack.c.bf16 %v235_v52, %v232_v51  ;;  %1150 = vmatpush3.bf16.msra.mxu1 %v1258_v5 }
 0x10c   :  { %1151 = vmatprep.subr.bf16.mxu1 %v1259_v6 }
 0x10d   :  { %v1077_v55 = vpop.f32.mrb[12].mxu0  ;;  %1103 = vmatprep.mubr.bf16.mxu1 %v266_v54 }
 0x10e   :  { %v247_v56 = vpop.f32.mrb[13].mxu0  ;;  %1104 = vmatmul.mubr.bf16.gmra.mrb[8].mxu1 %v267_v53  ;;  %v256_v58 = vadd.f32 %v1077_v55, %v924_v25 }
 0x10f   :  { %v1078_v57 = vpop.f32.mrb[14].mxu0  ;;  %v248_v61 = vadd.f32 %v924_v25, %v247_v56  ;;  %1152 = vmatpush3.bf16.msra.mxu1 %v1259_v6 }
 0x110   :  { %v259_v59 = vadd.f32 %v1078_v57, %v924_v25  ;;  %v250_v60 = vpop.f32.mrb[15].mxu0  ;;  %1153 = vmatprep.subr.bf16.mxu1 %v1260_v7 }
 0x111   :  { %v251_v62 = vadd.f32 %v924_v25, %v250_v60 }
 0x112   :  { %v269_v63 = vpack.c.bf16 %v259_v59, %v256_v58 }
 0x113   :  { %v268_v0 = vpack.c.bf16 %v251_v62, %v248_v61  ;;  %1154 = vmatpush3.bf16.msra.mxu1 %v1260_v7 }
 0x114   :  { %1155 = vmatprep.subr.bf16.mxu1 %v1261_v39 }
 0x115   :  { %1107 = vmatprep.mubr.bf16.mxu1 %v268_v0 }
 0x116   :  { %1108 = vmatmul.mubr.bf16.gmra.mrb[12].mxu1 %v269_v63 }
 0x117   :  { %1156 = vmatpush3.bf16.msra.mxu1 %v1261_v39 }
 0x118   :  { %1157 = vmatprep.subr.bf16.mxu1 %v1262_v40 }
 0x11b   :  { %1158 = vmatpush3.bf16.msra.mxu1 %v1262_v40 }
 0x1d1   :  { %v1097_v8 = vpop.f32.mrb[0].mxu1 }
 0x1d2   :  { %v368_v9 = vpop.f32.mrb[1].mxu1 }
 0x1d3   :  { %v1098_v10 = vpop.f32.mrb[2].mxu1 }
 0x1d4   :  { %v432_v11 = vpack.c.bf16 %v1098_v10, %v1097_v8  ;;  %v371_v12 = vpop.f32.mrb[3].mxu1 }
 0x1d5   :  { %v431_v13 = vpack.c.bf16 %v371_v12, %v368_v9 }
 0x1d7   :  { %1111 = vmatprep.subr.bf16.mxu0 %v431_v13 }
 0x1d8   :  { %1112 = vmatpush3.bf16.msra.mxu0 %v431_v13 }
 0x1d9   :  { %v1101_v14 = vpop.f32.mrb[4].mxu1  ;;  %1113 = vmatprep.subr.bf16.mxu0 %v432_v11 }
 0x1da   :  { %v384_v15 = vpop.f32.mrb[5].mxu1 }
 0x1db   :  { %v1102_v16 = vpop.f32.mrb[6].mxu1 }
 0x1dc   :  { %v434_v17 = vpack.c.bf16 %v1102_v16, %v1101_v14  ;;  %v387_v18 = vpop.f32.mrb[7].mxu1  ;;  %1114 = vmatpush3.bf16.msra.mxu0 %v432_v11 }
 0x1dd   :  { %v433_v19 = vpack.c.bf16 %v387_v18, %v384_v15 }
 0x1df   :  { %1115 = vmatprep.subr.bf16.mxu0 %v433_v19 }
 0x1e0   :  { %1116 = vmatpush3.bf16.msra.mxu0 %v433_v19 }
 0x1e1   :  { %v1105_v20 = vpop.f32.mrb[8].mxu1  ;;  %1117 = vmatprep.subr.bf16.mxu0 %v434_v17 }
 0x1e2   :  { %v400_v21 = vpop.f32.mrb[9].mxu1 }
 0x1e3   :  { %v1106_v22 = vpop.f32.mrb[10].mxu1 }
 0x1e4   :  { %v436_v23 = vpack.c.bf16 %v1106_v22, %v1105_v20  ;;  %v403_v24 = vpop.f32.mrb[11].mxu1  ;;  %1118 = vmatpush3.bf16.msra.mxu0 %v434_v17 }
 0x1e5   :  { %v435_v25 = vpack.c.bf16 %v403_v24, %v400_v21 }
 0x1e7   :  { %1119 = vmatprep.subr.bf16.mxu0 %v435_v25 }
 0x1e8   :  { %1120 = vmatpush3.bf16.msra.mxu0 %v435_v25 }
 0x1e9   :  { %v1109_v26 = vpop.f32.mrb[12].mxu1  ;;  %1121 = vmatprep.subr.bf16.mxu0 %v436_v23 }
 0x1ea   :  { %v416_v27 = vpop.f32.mrb[13].mxu1 }
 0x1eb   :  { %v1110_v28 = vpop.f32.mrb[14].mxu1 }
 0x1ec   :  { %v438_v29 = vpack.c.bf16 %v1110_v28, %v1109_v26  ;;  %v419_v30 = vpop.f32.mrb[15].mxu1  ;;  %1122 = vmatpush3.bf16.msra.mxu0 %v436_v23 }
 0x1ed   :  { %v437_v31 = vpack.c.bf16 %v419_v30, %v416_v27 }
 0x1ef   :  { %1123 = vmatprep.subr.bf16.mxu0 %v437_v31 }
 0x1f0   :  { %1124 = vmatpush3.bf16.msra.mxu0 %v437_v31 }
 0x1f1   :  { %1125 = vmatprep.subr.bf16.mxu0 %v438_v29 }
 0x1f4   :  { %1126 = vmatpush3.bf16.msra.mxu0 %v438_v29 }
 0x1f7   :  { %1128 = vmatmul.mubr.bf16.vlgmr.msra.gmra.mrb[16].mxu0 %v1410_v32 }
 0x1f8   :  { %1131 = vmatprep.mubr.bf16.mxu0 %v1415_v33 }
 0x1ff   :  { %1132 = vmatmul.mubr.bf16.gmra.mrb[20].mxu0 %v1422_v34 }
 0x200   :  { %1135 = vmatprep.mubr.bf16.mxu0 %v1427_v35 }
 0x207   :  { %1136 = vmatmul.mubr.bf16.gmra.mrb[24].mxu0 %v1434_v36 }
 0x208   :  { %1139 = vmatprep.mubr.bf16.mxu0 %v1439_v37 }
 0x20f   :  { %1140 = vmatmul.mubr.bf16.gmra.mrb[28].mxu0 %v1446_v38 }
 0x210   :  { %1191 = vmatprep.mubr.bf16.mxu0 %v1386_v1 }
 0x2ca   :  { %v1129_v42 = vpop.f32.mrb[16].mxu0 }
 0x2cb   :  { %v553_v43 = vadd.f32 %v1129_v42, %v949_v41  ;;  %v544_v44 = vpop.f32.mrb[17].mxu0 }
 0x2cc   :  { %v545_v45 = vadd.f32 %v949_v41, %v544_v44  ;;  %v1130_v46 = vpop.f32.mrb[18].mxu0 }
 0x2cd   :  { %v556_v47 = vadd.f32 %v1130_v46, %v949_v41  ;;  %v547_v48 = vpop.f32.mrb[19].mxu0  ;;  %v609_v50 = vmax.f32 %v553_v43, 0.0 }
 0x2ce   :  { %v548_v49 = vadd.f32 %v949_v41, %v547_v48  ;;  %v607_v52 = vmax.f32 %v545_v45, 0.0 }
 0x2cf   :  { %v610_v51 = vmax.f32 %v556_v47, 0.0 }
 0x2d0   :  { %v608_v53 = vmax.f32 %v548_v49, 0.0 }
 0x2d1   :  { %v624_v54 = vpack.c.bf16 %v610_v51, %v609_v50 }
 0x2d2   :  { %v623_v55 = vpack.c.bf16 %v608_v53, %v607_v52  ;;  %v1133_v56 = vpop.f32.mrb[20].mxu0 }
 0x2d3   :  { %v569_v57 = vadd.f32 %v1133_v56, %v949_v41  ;;  %v560_v58 = vpop.f32.mrb[21].mxu0 }
 0x2d4   :  { %v561_v59 = vadd.f32 %v949_v41, %v560_v58  ;;  %v1134_v60 = vpop.f32.mrb[22].mxu0  ;;  %1159 = vmatprep.mubr.bf16.mxu1 %v623_v55 }
 0x2d5   :  { %v572_v61 = vadd.f32 %v1134_v60, %v949_v41  ;;  %v563_v62 = vpop.f32.mrb[23].mxu0  ;;  %1160 = vmatmul.mubr.bf16.vlgmr.msra.gmra.mrb[16].mxu1 %v624_v54  ;;  %v613_v0 = vmax.f32 %v569_v57, 0.0 }
 0x2d6   :  { %v564_v63 = vadd.f32 %v949_v41, %v563_v62  ;;  %v611_v2 = vmax.f32 %v561_v59, 0.0 }
 0x2d7   :  { %v614_v1 = vmax.f32 %v572_v61, 0.0 }
 0x2d8   :  { %v612_v3 = vmax.f32 %v564_v63, 0.0 }
 0x2d9   :  { %v626_v4 = vpack.c.bf16 %v614_v1, %v613_v0  ;;  %v966_v0 = vld [vmem:[%s1524_s7] ss:$0 sm:$0xff] }
 0x2da   :  { %v625_v5 = vpack.c.bf16 %v612_v3, %v611_v2  ;;  %v1137_v6 = vpop.f32.mrb[24].mxu0 }
 0x2db   :  { %v585_v7 = vadd.f32 %v1137_v6, %v949_v41  ;;  %v576_v8 = vpop.f32.mrb[25].mxu0 }
 0x2dc   :  { %v577_v9 = vadd.f32 %v949_v41, %v576_v8  ;;  %v1138_v10 = vpop.f32.mrb[26].mxu0  ;;  %1163 = vmatprep.mubr.bf16.mxu1 %v625_v5 }
 0x2dd   :  { %v588_v11 = vadd.f32 %v1138_v10, %v949_v41  ;;  %v579_v12 = vpop.f32.mrb[27].mxu0  ;;  %1164 = vmatmul.mubr.bf16.gmra.mrb[20].mxu1 %v626_v4  ;;  %v617_v14 = vmax.f32 %v585_v7, 0.0 }
 0x2de   :  { %v580_v13 = vadd.f32 %v949_v41, %v579_v12  ;;  %v615_v16 = vmax.f32 %v577_v9, 0.0 }
 0x2df   :  { %v618_v15 = vmax.f32 %v588_v11, 0.0 }
 0x2e0   :  { %v616_v17 = vmax.f32 %v580_v13, 0.0 }
 0x2e1   :  { %v628_v18 = vpack.c.bf16 %v618_v15, %v617_v14 }
 0x2e2   :  { %v627_v19 = vpack.c.bf16 %v616_v17, %v615_v16  ;;  %v1141_v20 = vpop.f32.mrb[28].mxu0 }
 0x2e3   :  { %v601_v21 = vadd.f32 %v1141_v20, %v949_v41  ;;  %v592_v22 = vpop.f32.mrb[29].mxu0 }
 0x2e4   :  { %v593_v23 = vadd.f32 %v949_v41, %v592_v22  ;;  %v1142_v24 = vpop.f32.mrb[30].mxu0  ;;  %1167 = vmatprep.mubr.bf16.mxu1 %v627_v19 }
 0x2e5   :  { %v604_v25 = vadd.f32 %v1142_v24, %v949_v41  ;;  %v595_v26 = vpop.f32.mrb[31].mxu0  ;;  %1168 = vmatmul.mubr.bf16.gmra.mrb[24].mxu1 %v628_v18  ;;  %v621_v28 = vmax.f32 %v601_v21, 0.0 }
 0x2e6   :  { %v596_v27 = vadd.f32 %v949_v41, %v595_v26  ;;  %v619_v30 = vmax.f32 %v593_v23, 0.0 }
 0x2e7   :  { %v622_v29 = vmax.f32 %v604_v25, 0.0 }
 0x2e8   :  { %v620_v31 = vmax.f32 %v596_v27, 0.0 }
 0x2e9   :  { %v630_v39 = vpack.c.bf16 %v622_v29, %v621_v28 }
 0x2ea   :  { %v629_v40 = vpack.c.bf16 %v620_v31, %v619_v30 }
 0x2ec   :  { %1171 = vmatprep.mubr.bf16.mxu1 %v629_v40 }
 0x2ed   :  { %1172 = vmatmul.mubr.bf16.gmra.mrb[28].mxu1 %v630_v39 }
 0x2ee   :  { %1199 = vmatprep.mubr.bf16.mxu1 %v1427_v35 }
 0x3a8   :  { %v1161_v42 = vpop.f32.mrb[16].mxu1 }
 0x3a9   :  { %v729_v43 = vpop.f32.mrb[17].mxu1 }
 0x3aa   :  { %v1162_v44 = vpop.f32.mrb[18].mxu1 }
 0x3ab   :  { %v793_v45 = vpack.c.bf16 %v1162_v44, %v1161_v42  ;;  %v732_v46 = vpop.f32.mrb[19].mxu1 }
 0x3ac   :  { %v792_v47 = vpack.c.bf16 %v732_v46, %v729_v43 }
 0x3ae   :  { %1175 = vmatprep.subr.bf16.mxu0 %v792_v47  ;;  %1207 = vmatprep.subr.bf16.mxu1 %v792_v47 }
 0x3af   :  { %1176 = vmatpush3.bf16.msra.mxu0 %v792_v47  ;;  %1215 = vmatpush3.bf16.msra.mxu1 %v792_v47 }
 0x3b0   :  { %v1165_v41 = vpop.f32.mrb[20].mxu1  ;;  %1177 = vmatprep.subr.bf16.mxu0 %v793_v45  ;;  %1208 = vmatprep.subr.bf16.mxu1 %v793_v45 }
 0x3b1   :  { %v745_v48 = vpop.f32.mrb[21].mxu1 }
 0x3b2   :  { %v1166_v49 = vpop.f32.mrb[22].mxu1 }
 0x3b3   :  { %v795_v50 = vpack.c.bf16 %v1166_v49, %v1165_v41  ;;  %v748_v51 = vpop.f32.mrb[23].mxu1  ;;  %1178 = vmatpush3.bf16.msra.mxu0 %v793_v45  ;;  %1216 = vmatpush3.bf16.msra.mxu1 %v793_v45 }
 0x3b4   :  { %v794_v35 = vpack.c.bf16 %v748_v51, %v745_v48 }
 0x3b6   :  { %1179 = vmatprep.subr.bf16.mxu0 %v794_v35  ;;  %1209 = vmatprep.subr.bf16.mxu1 %v794_v35 }
 0x3b7   :  { %1180 = vmatpush3.bf16.msra.mxu0 %v794_v35  ;;  %1217 = vmatpush3.bf16.msra.mxu1 %v794_v35 }
 0x3b8   :  { %v1169_v52 = vpop.f32.mrb[24].mxu1  ;;  %1181 = vmatprep.subr.bf16.mxu0 %v795_v50  ;;  %1210 = vmatprep.subr.bf16.mxu1 %v795_v50 }
 0x3b9   :  { %v761_v53 = vpop.f32.mrb[25].mxu1 }
 0x3ba   :  { %v1170_v54 = vpop.f32.mrb[26].mxu1 }
 0x3bb   :  { %v797_v55 = vpack.c.bf16 %v1170_v54, %v1169_v52  ;;  %v764_v56 = vpop.f32.mrb[27].mxu1  ;;  %1182 = vmatpush3.bf16.msra.mxu0 %v795_v50  ;;  %1218 = vmatpush3.bf16.msra.mxu1 %v795_v50 }
 0x3bc   :  { %v796_v57 = vpack.c.bf16 %v764_v56, %v761_v53 }
 0x3be   :  { %1183 = vmatprep.subr.bf16.mxu0 %v796_v57  ;;  %1211 = vmatprep.subr.bf16.mxu1 %v796_v57 }
 0x3bf   :  { %1184 = vmatpush3.bf16.msra.mxu0 %v796_v57  ;;  %1219 = vmatpush3.bf16.msra.mxu1 %v796_v57 }
 0x3c0   :  { %v1173_v58 = vpop.f32.mrb[28].mxu1  ;;  %1185 = vmatprep.subr.bf16.mxu0 %v797_v55  ;;  %1212 = vmatprep.subr.bf16.mxu1 %v797_v55 }
 0x3c1   :  { %v777_v59 = vpop.f32.mrb[29].mxu1 }
 0x3c2   :  { %v1174_v60 = vpop.f32.mrb[30].mxu1 }
 0x3c3   :  { %v799_v61 = vpack.c.bf16 %v1174_v60, %v1173_v58  ;;  %v780_v62 = vpop.f32.mrb[31].mxu1  ;;  %1186 = vmatpush3.bf16.msra.mxu0 %v797_v55  ;;  %1220 = vmatpush3.bf16.msra.mxu1 %v797_v55 }
 0x3c4   :  { %v798_v63 = vpack.c.bf16 %v780_v62, %v777_v59 }
 0x3c6   :  { %1187 = vmatprep.subr.bf16.mxu0 %v798_v63  ;;  %1213 = vmatprep.subr.bf16.mxu1 %v798_v63 }
 0x3c7   :  { %1188 = vmatpush3.bf16.msra.mxu0 %v798_v63  ;;  %1221 = vmatpush3.bf16.msra.mxu1 %v798_v63 }
 0x3c8   :  { %1189 = vmatprep.subr.bf16.mxu0 %v799_v61  ;;  %1214 = vmatprep.subr.bf16.mxu1 %v799_v61 }
 0x3cb   :  { %1190 = vmatpush3.bf16.msra.mxu0 %v799_v61  ;;  %1222 = vmatpush3.bf16.msra.mxu1 %v799_v61 }
 0x3ce   :  { %1192 = vmatmul.mubr.bf16.vlgmr.msra.gmra.mrb[32].mxu0 %v1410_v32  ;;  %1200 = vmatmul.mubr.bf16.vlgmr.msra.gmra.mrb[32].mxu1 %v1434_v36 }
 0x3cf   :  { %1195 = vmatprep.mubr.bf16.mxu0 %v1415_v33  ;;  %1203 = vmatprep.mubr.bf16.mxu1 %v1439_v37 }
 0x3d6   :  { %1196 = vmatmul.mubr.bf16.gmra.mrb[36].mxu0 %v1422_v34  ;;  %1204 = vmatmul.mubr.bf16.gmra.mrb[36].mxu1 %v1446_v38 }
 0x4a1   :  { %v1193_v1 = vpop.f32.mrb[32].mxu0  ;;  %v1201_v2 = vpop.f32.mrb[32].mxu1 }
 0x4a2   :  { %v850_v3 = vadd.f32 %v1193_v1, %v966_v0  ;;  %v882_v4 = vadd.f32 %v1201_v2, %v966_v0  ;;  %v841_v5 = vpop.f32.mrb[33].mxu0  ;;  %v873_v32 = vpop.f32.mrb[33].mxu1 }
 0x4a3   :  { %v842_v6 = vadd.f32 %v966_v0, %v841_v5  ;;  %v874_v36 = vadd.f32 %v966_v0, %v873_v32  ;;  %v1194_v7 = vpop.f32.mrb[34].mxu0  ;;  %v1202_v33 = vpop.f32.mrb[34].mxu1 }
 0x4a4   :  { %906 = vst [vmem:[%s1525_s8 + $0x10] sm:$0xff] %v850_v3  ;;  %914 = vst [vmem:[%s1525_s8 + $0x50] sm:$0xff] %v882_v4  ;;  %v853_v34 = vadd.f32 %v1194_v7, %v966_v0  ;;  %v885_v37 = vadd.f32 %v1202_v33, %v966_v0  ;;  %v844_v38 = vpop.f32.mrb[35].mxu0  ;;  %v876_v8 = vpop.f32.mrb[35].mxu1 }
 0x4a5   :  { %904 = vst [vmem:[%s1525_s8] sm:$0xff] %v842_v6  ;;  %912 = vst [vmem:[%s1525_s8 + $0x40] sm:$0xff] %v874_v36  ;;  %v845_v9 = vadd.f32 %v966_v0, %v844_v38  ;;  %v877_v10 = vadd.f32 %v966_v0, %v876_v8 }
 0x4a6   :  { %907 = vst [vmem:[%s1525_s8 + $0x18] sm:$0xff] %v853_v34  ;;  %915 = vst [vmem:[%s1525_s8 + $0x58] sm:$0xff] %v885_v37 }
 0x4a7   :  { %905 = vst [vmem:[%s1525_s8 + $0x8] sm:$0xff] %v845_v9  ;;  %913 = vst [vmem:[%s1525_s8 + $0x48] sm:$0xff] %v877_v10 }
 0x4a9   :  { %v1197_v11 = vpop.f32.mrb[36].mxu0  ;;  %v1205_v12 = vpop.f32.mrb[36].mxu1 }
 0x4aa   :  { %v866_v13 = vadd.f32 %v1197_v11, %v966_v0  ;;  %v898_v14 = vadd.f32 %v1205_v12, %v966_v0  ;;  %v857_v15 = vpop.f32.mrb[37].mxu0  ;;  %v889_v16 = vpop.f32.mrb[37].mxu1 }
 0x4ab   :  { %v858_v17 = vadd.f32 %v966_v0, %v857_v15  ;;  %v890_v18 = vadd.f32 %v966_v0, %v889_v16  ;;  %v1198_v19 = vpop.f32.mrb[38].mxu0  ;;  %v1206_v20 = vpop.f32.mrb[38].mxu1 }
 0x4ac   :  { %910 = vst [vmem:[%s1525_s8 + $0x30] sm:$0xff] %v866_v13  ;;  %918 = vst [vmem:[%s1525_s8 + $0x70] sm:$0xff] %v898_v14  ;;  %v869_v21 = vadd.f32 %v1198_v19, %v966_v0  ;;  %v901_v22 = vadd.f32 %v1206_v20, %v966_v0  ;;  %v860_v23 = vpop.f32.mrb[39].mxu0  ;;  %v892_v24 = vpop.f32.mrb[39].mxu1 }
 0x4ad   :  { %908 = vst [vmem:[%s1525_s8 + $0x20] sm:$0xff] %v858_v17  ;;  %916 = vst [vmem:[%s1525_s8 + $0x60] sm:$0xff] %v890_v18  ;;  %v861_v25 = vadd.f32 %v966_v0, %v860_v23  ;;  %v893_v26 = vadd.f32 %v966_v0, %v892_v24 }
 0x4ae   :  { %911 = vst [vmem:[%s1525_s8 + $0x38] sm:$0xff] %v869_v21  ;;  %919 = vst [vmem:[%s1525_s8 + $0x78] sm:$0xff] %v901_v22 }
 0x4af   :  { %909 = vst [vmem:[%s1525_s8 + $0x28] sm:$0xff] %v861_v25  ;;  %917 = vst [vmem:[%s1525_s8 + $0x68] sm:$0xff] %v893_v26 }

</bundles_post_ra>
